<compile_context>
chip_gen: v7x
topology: tpu7x:2x2x1
jax: 0.10.0
libtpu: 0.0.40
codegen_flags: <defaults>
</compile_context>

<pallas_src>
import jax
import jax.numpy as jnp
from jax.experimental import pallas as pl
from jax.experimental.pallas import tpu as pltpu


def _pos_embed_kernel(x_ref, pos_ref, o_ref):
    # x_ref  : (Cp, tHW)  one batch element's channel-major tile
    # pos_ref: (tHW, Cp)  shared position-embedding tile (resident across batch)
    # o_ref  : (tHW, Cp)
    # (Cp, tHW) -> (tHW, Cp) relayout on the XLU, add on the VPU.
    o_ref[...] = jnp.transpose(x_ref[...], (1, 0)) + pos_ref[...]


def _transpose_only_kernel(x_ref, o_ref):
    o_ref[...] = jnp.transpose(x_ref[...], (1, 0))


def _round_up(x, m):
    return ((x + m - 1) // m) * m


def _pick_hw_tile(hw, cp, itemsize, max_tile_bytes=2 * 1024 * 1024):
    """Largest 128-multiple HW tile with (tHW, Cp) buffer <= max_tile_bytes,
    preferring the candidate that minimizes HW padding."""
    cap = max(128, (max_tile_bytes // (cp * itemsize)) // 128 * 128)
    candidates = [t for t in (1024, 512, 256, 128) if t <= cap] or [128]
    # minimize padded HW; tie-break toward the larger tile
    return min(candidates, key=lambda t: (_round_up(hw, t), -t))


def position_embedding_forward(feat_nchw, position_param=None, *, use_position=True):
    """feat_nchw: (B, C, H, W); position_param: (1, H*W, C) (required if use_position)."""
    B, C, H, W = feat_nchw.shape
    HW = H * W
    dtype = feat_nchw.dtype
    itemsize = jnp.dtype(dtype).itemsize

    Cp = _round_up(C, 128)                 # lane-dense output last dim
    tHW = _pick_hw_tile(HW, Cp, itemsize)  # 128-multiple HW tile
    HWp = _round_up(HW, tHW)
    needs_pad = (Cp != C) or (HWp != HW)

    # Glue (cheap, outside the hot loop): flatten spatial dims (a view) and
    # zero-pad C / HW up to the lane-dense tiled extents.
    x_flat = feat_nchw.reshape(B, C, HW)
    if needs_pad:
        x_flat = jnp.pad(x_flat, ((0, 0), (0, Cp - C), (0, HWp - HW)))

    grid = (HWp // tHW, B)                 # hw tiles OUTER, batch INNER
    tile_bytes = tHW * Cp * itemsize
    n_operands = 3 if use_position else 2
    vmem_limit = min(
        64 * 1024 * 1024,
        max(16 * 1024 * 1024, 2 * n_operands * tile_bytes + 2 * tile_bytes),
    )

    x_spec = pl.BlockSpec((None, Cp, tHW), lambda hw, b: (b, 0, hw))
    out_spec = pl.BlockSpec((None, tHW, Cp), lambda hw, b: (b, hw, 0))
    out_shape = jax.ShapeDtypeStruct((B, HWp, Cp), dtype)

    compiler_params = pltpu.CompilerParams(
        dimension_semantics=("parallel", "parallel"),
        vmem_limit_bytes=vmem_limit,
    )

    if use_position:
        assert position_param is not None, "position_param required when use_position=True"
        pos = position_param.astype(dtype)
        if needs_pad:
            pos = jnp.pad(pos, ((0, 0), (0, HWp - HW), (0, Cp - C)))
        cost = pl.CostEstimate(
            flops=B * HWp * Cp,
            transcendentals=0,
            bytes_accessed=itemsize * (2 * B * HWp * Cp + HWp * Cp),
        )
        out = pl.pallas_call(
            _pos_embed_kernel,
            out_shape=out_shape,
            grid_spec=pltpu.PrefetchScalarGridSpec(
                num_scalar_prefetch=0,
                grid=grid,
                in_specs=[
                    x_spec,
                    # Block index depends only on the OUTER hw axis, so the pos
                    # tile is not re-DMA'd across the inner batch loop.
                    pl.BlockSpec((None, tHW, Cp), lambda hw, b: (0, hw, 0)),
                ],
                out_specs=out_spec,
            ),
            compiler_params=compiler_params,
            cost_estimate=cost,
        )(x_flat, pos)
    else:
        cost = pl.CostEstimate(
            flops=0,
            transcendentals=0,
            bytes_accessed=itemsize * 2 * B * HWp * Cp,
        )
        out = pl.pallas_call(
            _transpose_only_kernel,
            out_shape=out_shape,
            grid_spec=pltpu.PrefetchScalarGridSpec(
                num_scalar_prefetch=0,
                grid=grid,
                in_specs=[x_spec],
                out_specs=out_spec,
            ),
            compiler_params=compiler_params,
            cost_estimate=cost,
        )(x_flat)

    if needs_pad:
        out = out[:, :HW, :C]
    return out


if __name__ == "__main__":
    # Small, shape-consistent example:
    #   backbone feature map: B=2, C=vec_dim=32, H=W=num_patches=8 -> HW = 64
    B, C, H, W = 2, 32, 8, 8
    num_patches = H          # num_patches ** 2 == H * W
    vec_dim = C

    key = jax.random.PRNGKey(0)
    k_feat, k_pos = jax.random.split(key)

    feat = jax.random.normal(k_feat, (B, C, H, W), dtype=jnp.float32)
    position = jax.random.normal(k_pos, (1, num_patches ** 2, vec_dim),
                                 dtype=jnp.float32)

    # With position add (the default module behavior).
    out = position_embedding_forward(feat, position, use_position=True)
    out = jax.block_until_ready(out)

    # Pure-JAX reference of the PyTorch forward (minus the backbone).
    ref = jnp.transpose(feat.reshape(B, C, H * W), (0, 2, 1)) + position
    assert out.shape == (B, H * W, C)
    assert jnp.allclose(out, ref, atol=1e-6, rtol=1e-6)

    # position=False variant: no position operand is passed to the kernel.
    out_nopos = position_embedding_forward(feat, use_position=False)
    out_nopos = jax.block_until_ready(out_nopos)
    ref_nopos = jnp.transpose(feat.reshape(B, C, H * W), (0, 2, 1))
    assert jnp.allclose(out_nopos, ref_nopos, atol=1e-6, rtol=1e-6)

    print("KERNEL_OK")
</pallas_src>

<mosaic_0001>
module attributes {stable_mosaic.version = 11 : i64} {
  func.func @_pos_embed_kernel(%arg0: i32, %arg1: i32, %arg2: memref<1x128x128xf32, #tpu.memory_space<vmem>>, %arg3: memref<1x128x128xf32, #tpu.memory_space<vmem>>, %arg4: memref<1x128x128xf32, #tpu.memory_space<vmem>>) attributes {dimension_semantics = [#tpu.dimension_semantics<parallel>, #tpu.dimension_semantics<parallel>], iteration_bounds = array<i64: 1, 2>, scalar_prefetch = 0 : i64, scratch_operands = 0 : i64, tpu.core_type = #tpu.core_type<tc>, window_params = [{transform_indices = @transform_0, window_bounds = array<i64: 1, 128, 128>}, {transform_indices = @transform_1, window_bounds = array<i64: 1, 128, 128>}, {transform_indices = @transform_2, window_bounds = array<i64: 1, 128, 128>}]} {
    %c0 = arith.constant 0 : index
    %c0_0 = arith.constant 0 : index
    %c0_1 = arith.constant 0 : index
    %0 = vector.load %arg2[%c0, %c0_0, %c0_1] : memref<1x128x128xf32, #tpu.memory_space<vmem>>, vector<1x128x128xf32>
    %1 = vector.shape_cast %0 : vector<1x128x128xf32> to vector<128x128xf32>
    %2 = tpu.transpose %1, [1, 0] : vector<128x128xf32> -> vector<128x128xf32>
    %c0_2 = arith.constant 0 : index
    %c0_3 = arith.constant 0 : index
    %c0_4 = arith.constant 0 : index
    %3 = vector.load %arg3[%c0_2, %c0_3, %c0_4] : memref<1x128x128xf32, #tpu.memory_space<vmem>>, vector<1x128x128xf32>
    %4 = vector.shape_cast %3 : vector<1x128x128xf32> to vector<128x128xf32>
    %5 = arith.addf %2, %4 : vector<128x128xf32>
    %c0_5 = arith.constant 0 : index
    %c0_6 = arith.constant 0 : index
    %c0_7 = arith.constant 0 : index
    %6 = vector.load %arg4[%c0_5, %c0_6, %c0_7] : memref<1x128x128xf32, #tpu.memory_space<vmem>>, vector<1x128x128xf32>
    %7 = vector.shape_cast %6 : vector<1x128x128xf32> to vector<128x128xf32>
    %8 = vector.shape_cast %5 : vector<128x128xf32> to vector<1x128x128xf32>
    tpu.vector_store %arg4[%c0_5, %c0_6, %c0_7], %8 {strides = array<i32>} : memref<1x128x128xf32, #tpu.memory_space<vmem>>, vector<1x128x128xf32>,
    return
  }
  func.func @transform_0(%arg0: i32, %arg1: i32) -> (i32, i32, i32) {
    %c0_i32 = arith.constant 0 : i32
    %c0_i32_0 = arith.constant 0 : i32
    return %arg1, %c0_i32, %arg0 : i32, i32, i32
  }
  func.func @transform_1(%arg0: i32, %arg1: i32) -> (i32, i32, i32) {
    %c0_i32 = arith.constant 0 : i32
    %c0_i32_0 = arith.constant 0 : i32
    %c0_i32_1 = arith.constant 0 : i32
    return %c0_i32, %arg0, %c0_i32_0 : i32, i32, i32
  }
  func.func @transform_2(%arg0: i32, %arg1: i32) -> (i32, i32, i32) {
    %c0_i32 = arith.constant 0 : i32
    %c0_i32_0 = arith.constant 0 : i32
    return %arg1, %arg0, %c0_i32 : i32, i32, i32
  }
}

</mosaic_0001>

<bundles_post_ra>
// kernel: tpu_custom_call.1
= control target key start
LH: loop header
LB: loop body
LE: loop exit
PB: predicated region body
PF: predicated region fallthrough
CT: control target
= control target key end

     0   :  { %7 = vsyncpa [#allocation3], 0  ;;  %s944_s0 = inlined_call_operand.hbm [shape: f32[2,128,128], index: 0, kind: input, shape index: {}]   ;;  %s945_s1 = inlined_call_operand.hbm [shape: f32[1,128,128], index: 1, kind: input, shape index: {}]   ;;  %s946_s2 = inlined_call_operand.hbm [shape: f32[2,128,128], index: 2, kind: output, shape index: {}]  }
   0x1   :  { %9 = vsyncpa [#allocation3 + $0x1], 0 }
   0x2   :  { %10 = vsyncpa [#allocation6], 0 }
   0x3   :  { %11 = vsyncpa [#allocation4], 0 }
   0x4   :  { %13 = vsyncpa [#allocation4 + $0x1], 0  ;;  %s678_s9 = smov 0   ;;  %s680_s10 = smov 0  }
   0x5   :  { %s682_s11 = smov 0   ;;  %s684_s12 = smov 0  }
   0x6   :  { %s686_s13 = smov 0   ;;  %s688_s14 = smov 0  }
   0x7 LB: > { %s414_s15 = sadd.s32 4294967295, %s654_s14   ;;  %s415_s16 = sadd.s32 4294967294, %s654_s14   ;;  %s654_s14 = sphi %s688_s14, %s19_s14   ;;  %s650_s13 = sphi %s686_s13, %s970_s13   ;;  %s646_s12 = sphi %s684_s12, %s969_s12   ;;  %s642_s11 = sphi %s682_s11, %s968_s11   ;;  %s638_s10 = sphi %s680_s10, %s967_s10   ;;  %s634_s9 = sphi %s678_s9, %s966_s9  }
   0x8   : > { %p53_p0 = scmp.ne.s32.totalorder %s638_s10, %s634_s9  ;;  %p712_p1 = scmp.eq.s32.totalorder %s414_s15, 0 }
   0x9   : > { %p716_p2 = scmp.eq.s32.totalorder %s414_s15, 1  ;;  %p111_p3 = scmp.eq.s32.totalorder %s415_s16, 1 }
   0xa   : > { %s951_s17 = scalar_select %p712_p1, 1, 0 }
   0xb   : > { %s952_s18 = scalar_select %p716_p2, 1, 0 }
   0xc   : > { %p722_p4 = por %p712_p1, %p53_p0  ;;  %p416_p5 = scmp.ge.s32.totalorder %s654_s14, 1 }
   0xd   : > { %p727_p6 = por %p111_p3, %p53_p0  ;;  %p118_p7 = scmp.lt.s32.totalorder %s654_s14, 3 }
   0xe   : > { %s953_s19 = scalar_select %p722_p4, 1, 0 }
   0xf   : > { %s954_s20 = scalar_select %p727_p6, 1, 0 }
  0x10   : > { %p732_p8 = pnand %p416_p5, %p118_p7  ;;  %s656_s22 = smov [#allocation5]  }
  0x11   : > { %s133_s23 = sshll.u32 %s656_s22, 4  ;;  %s28_s25 = sadd.s32 1, %s650_s13  ;;  %s134_s23 = int_to_ptr.vmem [resolvable:$true] %s133_s23 }
  0x12   : > { %s955_s21 = scalar_select %p732_p8, 1, 0 }
  0x13   : > { %p441_p9 = pneg %p732_p8  ;;  %s510_s28 = scalar_lea.hbm %s945_s1, 2048 }
  0x14   : > { %p511_p12 = scmp.ne.s32.totalorder %s945_s1, %s510_s28  ;;  %p517_p5 = scmp.lt.u32.totalorder %s510_s28, %s945_s1 }
  0x15   : > { %p741_p11 = pnand %p441_p9, %p712_p1 }
  0x17   : > { %p512_p13 = pneg %p741_p11 }
  0x19   : > { %p513_p0 = pnand %p512_p13, %p511_p12 }
  0x1b   : > { %p514_p3 = pneg %p513_p0 }
  0x1d   : > { %p519_p7 = pnand %p517_p5, %p514_p3 }
  0x1f   : > { %522 = shalt.err (!%p519_p7)
}
  0x20   : > { %s523_s5 = scalar_lea.vmem %s134_s23, 2048  ;;  %p531_p1 = scmp.lt.s32.totalorder %s134_s23, %s134_s23 }
  0x21   : > { %p524_p9 = scmp.ne.s32.totalorder %s134_s23, %s523_s5  ;;  %p532_p4 = scmp.lt.s32.totalorder %s523_s5, %s523_s5 }
  0x23   : > { %p526_p10 = pnand %p524_p9, %p512_p13  ;;  %p533_p8 = por %p532_p4, %p531_p1 }
  0x25   : > { %p527_p6 = pneg %p526_p10 }
  0x27   : > { %p534_p2 = pnand %p533_p8, %p527_p6 }
  0x29   : > { %537 = shalt.err (!%p534_p2)
}
  0x2a   : > { %s657_s6 = smov 128   ;;  %s658_s7 = smov 8  }
  0x2b   : > { %444 = dma.hbm_to_vmem [thread:$0]  (!%p741_p11), %s945_s1, 2048, %s134_s23, [#allocation6], %s657_s6, %s657_s6, %s658_s7  }
  0x2c   : > { %p29_p1 = scmp.ge.s32.totalorder %s28_s25, 2  ;;  %s40_s16 = sadd.s32 1, %s642_s11 }
  0x2d   : > { %p47_p2 = scmp.ne.s32.totalorder %s642_s11, %s638_s10  ;;  %p48_p4 = scmp.eq.s32.totalorder %s654_s14, 0 }
  0x2e   : > { %s972_s25 = smov (%p29_p1, %s28_s25), 0  ;;  %p958_p8 = scmp.ne.s32.totalorder %s952_s18, 0 }
  0x2f   : > { %p771_p6 = por %p48_p4, %p47_p2  ;;  %s35_s26 = ssub.s32 %s650_s13, %s972_s25 }
  0x30   : > { %p777_p10 = por %p958_p8, %p47_p2  ;;  %p454_p12 = scmp.lt.s32.totalorder %s654_s14, 2 }
  0x31   : > { %p38_p11 = scmp.eq.s32.totalorder %s35_s26, 0  ;;  %s147_s23 = sand.u32 1, %s642_s11  }
  0x32   : > { %s419_s27 = sshll.u32 %s147_s23, 7  ;;  %s431_s29 = sshll.u32 %s650_s13, 11 }
  0x33   : > { %s786_s28 = scalar_select %p38_p11, %s642_s11, %s40_s16  }
  0x34   : > { %s792_s4 = scalar_lea.hbm %s944_s0, %s431_s29  ;;  %s151_s18 = scalar_lea.vmem [#allocation2], %s419_s27 }
  0x35   : > { %s159_s5 = sshll.u32 %s151_s18, 4  ;;  %p798_p13 = pnand %p454_p12, %p771_p6  ;;  %s794_s5 = int_to_ptr.vmem [resolvable:$true] %s159_s5 }
  0x36   : > { %s802_s15 = scalar_lea.sflag [#allocation3], %s147_s23  ;;  %s538_s16 = scalar_lea.hbm %s792_s4, 2048 }
  0x37   : > { %p539_p0 = scmp.ne.s32.totalorder %s792_s4, %s538_s16  ;;  %p540_p3 = pneg %p798_p13 }
  0x38   : > { %s543_s22 = scalar_lea.hbm %s944_s0, 4096  ;;  %p544_p9 = scmp.lt.u32.totalorder %s792_s4, %s944_s0 }
  0x39   : > { %p541_p5 = pnand %p540_p3, %p539_p0  ;;  %p545_p1 = scmp.lt.u32.totalorder %s543_s22, %s538_s16 }
  0x3a   : > { %p547_p4 = scmp.lt.u32.totalorder %s538_s16, %s792_s4 }
  0x3b   : > { %p542_p7 = pneg %p541_p5  ;;  %p546_p2 = por %p545_p1, %p544_p9 }
  0x3d   : > { %p548_p6 = por %p547_p4, %p546_p2 }
  0x3f   : > { %p549_p8 = pnand %p548_p6, %p542_p7 }
  0x41   : > { %552 = shalt.err (!%p549_p8)
}
  0x42   : > { %s553_s23 = scalar_lea.vmem %s794_s5, 2048  ;;  %s659_s3 = smov [#allocation2]  }
  0x43   : > { %p554_p12 = scmp.ne.s32.totalorder %s794_s5, %s553_s23  ;;  %s558_s18 = sshll.u32 %s659_s3, 4  ;;  %s559_s18 = int_to_ptr.vmem [resolvable:$false] %s558_s18 }
  0x44   : > { %s560_s26 = scalar_lea.vmem %s559_s18, 4096  ;;  %p561_p5 = scmp.lt.s32.totalorder %s794_s5, %s559_s18 }
  0x45   : > { %p556_p11 = pnand %p554_p12, %p540_p3  ;;  %p562_p9 = scmp.lt.s32.totalorder %s560_s26, %s553_s23 }
  0x47   : > { %p557_p0 = pneg %p556_p11  ;;  %p563_p1 = por %p562_p9, %p561_p5 }
  0x49   : > { %p564_p2 = pnand %p563_p1, %p557_p0 }
  0x4b   : > { %567 = shalt.err (!%p564_p2)
}
  0x4c   : > { %448 = dma.hbm_to_vmem [thread:$0]  (!%p798_p13), %s792_s4, 2048, %s794_s5, %s802_s15, %s657_s6, %s657_s6, %s658_s7  }
  0x4d   : > { %p961_p3 = scmp.ne.s32.totalorder %s955_s21, 0 }
  0x4e   : > { %s836_s16 = sand.u32 (!%p961_p3), 1, %s638_s10   ;;  %p962_p7 = scmp.ne.s32.totalorder (!%p961_p3), %s953_s19, 0 }
  0x4f   : > { %171 = sbr.rel (%p961_p3) target bundleno = 297 (0x129), region = 28  ;;  %s423_s27 = sshll.u32 (!%p961_p3), %s836_s16, 7 }
  0x50   : > { %s174_s22 = scalar_lea.sflag (!%p961_p3), [#allocation3], %s836_s16  ;;  %s842_s8 = scalar_lea.vmem (!%p961_p3), [#allocation2], %s423_s27 }
  0x56   : > { %621 = dma.done.wait (%p962_p7), %s174_s22, 2048  }
  0x57   : > { %623 = vsyncadd (%p962_p7), %s174_s22, 4294965248  ;;  %p963_p13 = scmp.ne.s32.totalorder %s951_s17, 0 }
  0x59   : > { %625 = dma.done.wait (%p963_p13), [#allocation6], 2048  }
  0x5a   : > { %627 = vsyncadd (%p963_p13), [#allocation6], 4294965248  ;;  %v204_v0 = vld [vmem:[%s842_s8] sm:$0xff]  ;;  %v205_v1 = vld [vmem:[%s842_s8 + $0x8] sm:$0xff]  ;;  %s870_s17 = scalar_lea.vmem [#allocation7], %s423_s27  ;;  %s432_s19 = sshll.u32 %s646_s12, 11 }
  0x5b   : > { %220 = vxpose.xlu0.b32.start [1/16] %v204_v0, 128  ;;  %v206_v2 = vld [vmem:[%s842_s8 + $0x10] sm:$0xff]  ;;  %v207_v3 = vld [vmem:[%s842_s8 + $0x18] sm:$0xff]  ;;  %v208_v4 = vld [vmem:[%s842_s8 + $0x20] sm:$0xff]  ;;  %s316_s21 = sshll.u32 %s870_s17, 4  ;;  %s892_s4 = scalar_lea.hbm %s946_s2, %s432_s19  ;;  %s894_s21 = int_to_ptr.vmem [resolvable:$true] %s316_s21 }
  0x5c   : > { %v209_v5 = vld [vmem:[%s842_s8 + $0x28] sm:$0xff]  ;;  %v210_v6 = vld [vmem:[%s842_s8 + $0x30] sm:$0xff]  ;;  %v211_v7 = vld [vmem:[%s842_s8 + $0x38] sm:$0xff]  ;;  %s301_s5 = scalar_lea.sflag [#allocation4], %s836_s16  ;;  %s568_s15 = scalar_lea.vmem %s894_s21, 2048 }
  0x5d   : > { %v212_v8 = vld [vmem:[%s842_s8 + $0x40] sm:$0xff]  ;;  %v213_v9 = vld [vmem:[%s842_s8 + $0x48] sm:$0xff]  ;;  %v214_v10 = vld [vmem:[%s842_s8 + $0x50] sm:$0xff]  ;;  %p569_p4 = scmp.ne.s32.totalorder %s894_s21, %s568_s15  ;;  %s660_s12 = smov [#allocation7]  }
  0x5e   : > { %v215_v11 = vld [vmem:[%s842_s8 + $0x58] sm:$0xff]  ;;  %v216_v12 = vld [vmem:[%s842_s8 + $0x60] sm:$0xff]  ;;  %v217_v13 = vld [vmem:[%s842_s8 + $0x68] sm:$0xff]  ;;  %s572_s29 = sshll.u32 %s660_s12, 4  ;;  %s573_s29 = int_to_ptr.vmem [resolvable:$false] %s572_s29 }
  0x5f   : > { %221 = vxpose.xlu0.b32.cont [2/16] %v205_v1, 128  ;;  %v218_v14 = vld [vmem:[%s842_s8 + $0x70] sm:$0xff]  ;;  %v219_v15 = vld [vmem:[%s842_s8 + $0x78] sm:$0xff]  ;;  %v252_v16 = vld [vmem:[#allocation5] sm:$0xff]  ;;  %p570_p6 = pnand %p569_p4, %p777_p10  ;;  %s574_s30 = scalar_lea.vmem %s573_s29, 4096 }
  0x60   : > { %v253_v19 = vld [vmem:[#allocation5 + $0x8] sm:$0xff]  ;;  %v254_v22 = vld [vmem:[#allocation5 + $0x10] sm:$0xff]  ;;  %v255_v25 = vld [vmem:[#allocation5 + $0x18] sm:$0xff]  ;;  %p575_p12 = scmp.lt.s32.totalorder %s894_s21, %s573_s29  ;;  %p576_p11 = scmp.lt.s32.totalorder %s574_s30, %s568_s15 }
  0x61   : > { %v256_v28 = vld [vmem:[#allocation5 + $0x20] sm:$0xff]  ;;  %v257_v31 = vld [vmem:[#allocation5 + $0x28] sm:$0xff]  ;;  %v258_v34 = vld [vmem:[#allocation5 + $0x30] sm:$0xff]  ;;  %p571_p8 = pneg %p570_p6 }
  0x62   : > { %v259_v37 = vld [vmem:[#allocation5 + $0x38] sm:$0xff]  ;;  %v260_v40 = vld [vmem:[#allocation5 + $0x40] sm:$0xff]  ;;  %v261_v43 = vld [vmem:[#allocation5 + $0x48] sm:$0xff]  ;;  %p577_p0 = por %p576_p11, %p575_p12 }
  0x63   : > { %222 = vxpose.xlu0.b32.cont [3/16] %v206_v2, 128  ;;  %v262_v46 = vld [vmem:[#allocation5 + $0x50] sm:$0xff]  ;;  %v263_v49 = vld [vmem:[#allocation5 + $0x58] sm:$0xff]  ;;  %v264_v52 = vld [vmem:[#allocation5 + $0x60] sm:$0xff] }
  0x64   : > { %v265_v55 = vld [vmem:[#allocation5 + $0x68] sm:$0xff]  ;;  %v266_v58 = vld [vmem:[#allocation5 + $0x70] sm:$0xff]  ;;  %v267_v61 = vld [vmem:[#allocation5 + $0x78] sm:$0xff]  ;;  %p578_p5 = pnand %p577_p0, %p571_p8 }
  0x67   : > { %223 = vxpose.xlu0.b32.cont [4/16] %v207_v3, 128 }
  0x6b   : > { %224 = vxpose.xlu0.b32.cont [5/16] %v208_v4, 128 }
  0x6f   : > { %225 = vxpose.xlu0.b32.cont [6/16] %v209_v5, 128 }
  0x73   : > { %226 = vxpose.xlu0.b32.cont [7/16] %v210_v6, 128 }
  0x77   : > { %227 = vxpose.xlu0.b32.cont [8/16] %v211_v7, 128 }
  0x7b   : > { %228 = vxpose.xlu0.b32.cont [9/16] %v212_v8, 128 }
  0x7f   : > { %229 = vxpose.xlu0.b32.cont [10/16] %v213_v9, 128 }
  0x83   : > { %230 = vxpose.xlu0.b32.cont [11/16] %v214_v10, 128 }
  0x87   : > { %231 = vxpose.xlu0.b32.cont [12/16] %v215_v11, 128 }
  0x8b   : > { %232 = vxpose.xlu0.b32.cont [13/16] %v216_v12, 128 }
  0x8f   : > { %233 = vxpose.xlu0.b32.cont [14/16] %v217_v13, 128 }
  0x93   : > { %234 = vxpose.xlu0.b32.cont [15/16] %v218_v14, 128 }
  0x97   : > { %235 = vxpose.xlu0.b32.end [16/16] %v219_v15, 128 }
  0xdb   : > { %v236_v17 = vpop.trf.xlu0 }
  0xdc   : > { %v268_v18 = vadd.f32 %v252_v16, %v236_v17 }
  0xde   : > { %284 = vst [vmem:[%s870_s17] sm:$0xff] %v268_v18 }
  0xdf   : > { %v237_v20 = vpop.trf.xlu0 }
  0xe0   : > { %v269_v21 = vadd.f32 %v253_v19, %v237_v20 }
  0xe2   : > { %285 = vst [vmem:[%s870_s17 + $0x8] sm:$0xff] %v269_v21 }
  0xe3   : > { %v238_v23 = vpop.trf.xlu0 }
  0xe4   : > { %v270_v24 = vadd.f32 %v254_v22, %v238_v23 }
  0xe6   : > { %286 = vst [vmem:[%s870_s17 + $0x10] sm:$0xff] %v270_v24 }
  0xe7   : > { %v239_v26 = vpop.trf.xlu0 }
  0xe8   : > { %v271_v27 = vadd.f32 %v255_v25, %v239_v26 }
  0xea   : > { %287 = vst [vmem:[%s870_s17 + $0x18] sm:$0xff] %v271_v27 }
  0xeb   : > { %v240_v29 = vpop.trf.xlu0 }
  0xec   : > { %v272_v30 = vadd.f32 %v256_v28, %v240_v29 }
  0xee   : > { %288 = vst [vmem:[%s870_s17 + $0x20] sm:$0xff] %v272_v30 }
  0xef   : > { %v241_v32 = vpop.trf.xlu0 }
  0xf0   : > { %v273_v33 = vadd.f32 %v257_v31, %v241_v32 }
  0xf2   : > { %289 = vst [vmem:[%s870_s17 + $0x28] sm:$0xff] %v273_v33 }
  0xf3   : > { %v242_v35 = vpop.trf.xlu0 }
  0xf4   : > { %v274_v36 = vadd.f32 %v258_v34, %v242_v35 }
  0xf6   : > { %290 = vst [vmem:[%s870_s17 + $0x30] sm:$0xff] %v274_v36 }
  0xf7   : > { %v243_v38 = vpop.trf.xlu0 }
  0xf8   : > { %v275_v39 = vadd.f32 %v259_v37, %v243_v38 }
  0xfa   : > { %291 = vst [vmem:[%s870_s17 + $0x38] sm:$0xff] %v275_v39 }
  0xfb   : > { %v244_v41 = vpop.trf.xlu0 }
  0xfc   : > { %v276_v42 = vadd.f32 %v260_v40, %v244_v41 }
  0xfe   : > { %292 = vst [vmem:[%s870_s17 + $0x40] sm:$0xff] %v276_v42 }
  0xff   : > { %v245_v44 = vpop.trf.xlu0 }
 0x100   : > { %v277_v45 = vadd.f32 %v261_v43, %v245_v44 }
 0x102   : > { %293 = vst [vmem:[%s870_s17 + $0x48] sm:$0xff] %v277_v45 }
 0x103   : > { %v246_v47 = vpop.trf.xlu0 }
 0x104   : > { %v278_v48 = vadd.f32 %v262_v46, %v246_v47 }
 0x106   : > { %294 = vst [vmem:[%s870_s17 + $0x50] sm:$0xff] %v278_v48 }
 0x107   : > { %v247_v50 = vpop.trf.xlu0 }
 0x108   : > { %v279_v51 = vadd.f32 %v263_v49, %v247_v50 }
 0x10a   : > { %295 = vst [vmem:[%s870_s17 + $0x58] sm:$0xff] %v279_v51 }
 0x10b   : > { %v248_v53 = vpop.trf.xlu0 }
 0x10c   : > { %v280_v54 = vadd.f32 %v264_v52, %v248_v53 }
 0x10e   : > { %296 = vst [vmem:[%s870_s17 + $0x60] sm:$0xff] %v280_v54 }
 0x10f   : > { %v249_v56 = vpop.trf.xlu0 }
 0x110   : > { %v281_v57 = vadd.f32 %v265_v55, %v249_v56 }
 0x112   : > { %297 = vst [vmem:[%s870_s17 + $0x68] sm:$0xff] %v281_v57 }
 0x113   : > { %v250_v59 = vpop.trf.xlu0 }
 0x114   : > { %v282_v60 = vadd.f32 %v266_v58, %v250_v59 }
 0x116   : > { %298 = vst [vmem:[%s870_s17 + $0x70] sm:$0xff] %v282_v60 }
 0x117   : > { %v251_v62 = vpop.trf.xlu0 }
 0x118   : > { %v283_v63 = vadd.f32 %v267_v61, %v251_v62 }
 0x11a   : > { %299 = vst [vmem:[%s870_s17 + $0x78] sm:$0xff] %v283_v63 }
 0x11b   : > { %581 = shalt.err (!%p578_p5)
}
 0x11c   : > { %s582_s23 = scalar_lea.hbm %s892_s4, 2048  ;;  %s586_s26 = scalar_lea.hbm %s946_s2, 4096 }
 0x11d   : > { %p583_p9 = scmp.ne.s32.totalorder %s892_s4, %s582_s23  ;;  %p587_p3 = scmp.lt.u32.totalorder %s892_s4, %s946_s2 }
 0x11e   : > { %p588_p7 = scmp.lt.u32.totalorder %s586_s26, %s582_s23  ;;  %p590_p4 = scmp.lt.u32.totalorder %s582_s23, %s892_s4 }
 0x11f   : > { %p584_p1 = pnand %p583_p9, %p777_p10 }
 0x120   : > { %p589_p13 = por %p588_p7, %p587_p3 }
 0x121   : > { %p585_p2 = pneg %p584_p1 }
 0x122   : > { %p591_p6 = por %p590_p4, %p589_p13 }
 0x124   : > { %p592_p8 = pnand %p591_p6, %p585_p2 }
 0x126   : > { %595 = shalt.err (!%p592_p8)
}
 0x127   : > { %s661_s8 = smov 128   ;;  %s662_s17 = smov 8  }
 0x128   : > { %439 = dma.vmem_to_hbm [thread:$0]  (%p777_p10), %s894_s21, 2048, %s892_s4, %s301_s5, %s661_s8, %s661_s8, %s662_s17  }
 0x129 PF: > { %s331_s19 = sand.u32 1, %s634_s9   ;;  %p964_p12 = scmp.ne.s32.totalorder %s954_s20, 0 }
 0x12a   : > { %p965_p11 = scmp.ge.s32.totalorder %s654_s14, 2  ;;  %s332_s6 = scalar_lea.sflag [#allocation4], %s331_s19 }
 0x12c   : > { %p450_p0 = pnand %p965_p11, %p964_p12 }
 0x12e   : > { %629 = dma.done.wait (!%p450_p0), %s332_s6, 2048  }
 0x12f   : > { %631 = vsyncadd (!%p450_p0), %s332_s6, 4294965248  ;;  %s19_s14 = sadd.s32 1, %s654_s14   ;;  %s966_s9 = smov %s638_s10 }
 0x130   : > { %p16_p5 = scmp.ge.s32.totalorder %s19_s14, 4   ;;  %s967_s10 = smov %s642_s11 }
 0x131   : > { %s968_s11 = smov %s786_s28  ;;  %s969_s12 = smov %s650_s13 }
 0x132   : > { %s970_s13 = smov %s972_s25  ;;  %18 = sbr.rel (!%p16_p5) target bundleno = 7 (0x7), region = 78 }
 0x139   :  { %337 = vsyncpa [#allocation3], 1 }
 0x13a   :  { %339 = vsyncpa [#allocation3 + $0x1], 1 }
 0x13b   :  { %340 = vsyncpa [#allocation6], 1 }
 0x13c   :  { %341 = vsyncpa [#allocation4], 1 }
 0x13d   :  { %343 = vsyncpa [#allocation4 + $0x1], 1 }

</bundles_post_ra>
